<compile_context>
chip_gen: v7x
topology: tpu7x:2x2x1
jax: 0.10.0
libtpu: 0.0.40
codegen_flags: <defaults>
</compile_context>

<pallas_src>
import functools

import jax
import jax.numpy as jnp
from jax.experimental import pallas as pl
from jax.experimental.pallas import tpu as pltpu

HIDDEN = 256


def _round_up(x, m):
    return (x + m - 1) // m * m


def _device_kind():
    try:
        return jax.devices()[0].device_kind.lower()
    except Exception:
        return ""


def _batch_semantics():
    # v7x has 2 TensorCores per chip: shard the batch grid axis across them.
    return (pltpu.CORE_PARALLEL,) if "v7" in _device_kind() else ("parallel",)


def _relu_in_bf16():
    # v6e/v7x VALUs are bf16-capable; ReLU on packed bf16 touches half the vregs.
    kind = _device_kind()
    return ("v6" in kind) or ("v7" in kind)


def qnetwork_kernel(s_ref, a_ref, w1_ref, b1_ref, w2_ref, b2_ref, w3_ref, b3_ref,
                    o_ref, x_scr, *, state_dim, action_dim, relu_bf16):
    d_in = state_dim + action_dim
    k_pad = x_scr.shape[1]

    # Assemble the concatenated [state | action] row in a bf16 VMEM scratch tile
    # (in-kernel cast; single K=k_pad MXU pass instead of two tiny-K matmuls).
    x_scr[:, :state_dim] = s_ref[...].astype(jnp.bfloat16)
    x_scr[:, state_dim:d_in] = a_ref[...].astype(jnp.bfloat16)
    if k_pad > d_in:  # zero the padded K columns (w1 pad rows are zero too)
        x_scr[:, d_in:] = jnp.zeros((x_scr.shape[0], k_pad - d_in), jnp.bfloat16)

    # Layer 1 (single fused matmul, f32 accumulation, f32 bias add).
    h1 = jnp.dot(x_scr[...], w1_ref[...],
                 preferred_element_type=jnp.float32) + b1_ref[...]
    if relu_bf16:   # v6e / v7x: bf16 VALU -> cast first, ReLU on packed vregs
        h1 = jnp.maximum(h1.astype(jnp.bfloat16), jnp.array(0.0, jnp.bfloat16))
    else:           # v5e: no bf16 VALU -> ReLU in f32, then cast for the MXU
        h1 = jnp.maximum(h1, 0.0).astype(jnp.bfloat16)

    # Layer 2.
    h2 = jnp.dot(h1, w2_ref[...], preferred_element_type=jnp.float32) + b2_ref[...]
    h2 = jnp.maximum(h2, 0.0)

    # Layer 3 (out_features == 1): VPU multiply + lane reduction instead of an
    # N=1 MXU pass; emit lane-dense (1, tb) row (transpose lands on the XLU).
    q = jnp.sum(h2 * w3_ref[...], axis=-1) + b3_ref[0]        # (tb,)
    o_ref[...] = q[None, :]                                    # (1, tb)


def qnetwork_forward(state, action, params, *, block_b=4096):
    """state: [B, state_dim] f32, action: [B, action_dim] f32 -> [B, 1] f32."""
    w1, b1, w2, b2, w3, b3 = params
    B, state_dim = state.shape
    action_dim = action.shape[1]
    d_in_pad = w1.shape[0]                 # K padded to a multiple of 32 at init

    # Batch tile: multiple of 128 (lane-dense output block); pad B to whole tiles.
    tb = min(_round_up(block_b, 128), _round_up(B, 128))
    bp = _round_up(B, tb)
    if bp != B:
        pad = bp - B
        state = jnp.pad(state, ((0, pad), (0, 0)))
        action = jnp.pad(action, ((0, pad), (0, 0)))

    grid = (bp // tb,)
    kernel = functools.partial(qnetwork_kernel, state_dim=state_dim,
                               action_dim=action_dim, relu_bf16=_relu_in_bf16())

    out = pl.pallas_call(
        kernel,
        out_shape=jax.ShapeDtypeStruct((1, bp), jnp.float32),
        grid=grid,
        in_specs=[
            pl.BlockSpec((tb, state_dim), lambda i: (i, 0)),      # state tile (f32)
            pl.BlockSpec((tb, action_dim), lambda i: (i, 0)),     # action tile (f32)
            pl.BlockSpec((d_in_pad, HIDDEN), lambda i: (0, 0)),   # w1 (bf16, resident)
            pl.BlockSpec((1, HIDDEN), lambda i: (0, 0)),          # b1 (f32)
            pl.BlockSpec((HIDDEN, HIDDEN), lambda i: (0, 0)),     # w2 (bf16, resident)
            pl.BlockSpec((1, HIDDEN), lambda i: (0, 0)),          # b2 (f32)
            pl.BlockSpec((1, HIDDEN), lambda i: (0, 0)),          # w3 row (f32)
            pl.BlockSpec(memory_space=pltpu.MemorySpace.SMEM),    # b3 scalar
        ],
        out_specs=pl.BlockSpec((1, tb), lambda i: (0, i)),        # lane-dense Q row
        scratch_shapes=[pltpu.VMEM((tb, d_in_pad), jnp.bfloat16)],
        compiler_params=pltpu.CompilerParams(
            dimension_semantics=_batch_semantics(),
            vmem_limit_bytes=32 * 1024 * 1024,
        ),
    )(state, action, w1, b1, w2, b2, w3, b3)
    return out[0, :B].reshape(B, 1)


def init_params(key, state_dim, action_dim, hidden=HIDDEN):
    """nn.Linear-style U(-1/sqrt(fan_in), 1/sqrt(fan_in)) init.

    W1 rows for state/action are stacked (== concat([state, action], 1) @ W1),
    zero-padded along K to a multiple of 32, and matmul weights are converted to
    bf16 ONCE here (parameter-update time), never per forward call."""
    ks = jax.random.split(key, 6)
    d_in = state_dim + action_dim
    d_in_pad = _round_up(d_in, 32)

    def lin(kw, kb, fan_in, fan_out):
        bound = 1.0 / jnp.sqrt(jnp.float32(fan_in))
        w = jax.random.uniform(kw, (fan_in, fan_out), jnp.float32, -bound, bound)
        b = jax.random.uniform(kb, (1, fan_out), jnp.float32, -bound, bound)
        return w, b

    w1, b1 = lin(ks[0], ks[1], d_in, hidden)
    w2, b2 = lin(ks[2], ks[3], hidden, hidden)
    w3, b3 = lin(ks[4], ks[5], hidden, 1)
    w1_pad = jnp.zeros((d_in_pad, hidden), jnp.float32).at[:d_in].set(w1)
    return (w1_pad.astype(jnp.bfloat16), b1, w2.astype(jnp.bfloat16), b2,
            w3.T, b3.reshape((1,)))


def qnetwork_reference(state, action, params):
    """Pure-JAX reference using the same bf16-operand / f32-accum recipe."""
    w1, b1, w2, b2, w3, b3 = params
    d_in = state.shape[1] + action.shape[1]
    x = jnp.concatenate([state, action], axis=1).astype(jnp.bfloat16)
    h1 = jnp.dot(x, w1[:d_in], preferred_element_type=jnp.float32) + b1
    h1 = jnp.maximum(h1, 0.0).astype(jnp.bfloat16)
    h2 = jnp.dot(h1, w2, preferred_element_type=jnp.float32) + b2
    h2 = jnp.maximum(h2, 0.0)
    return jnp.sum(h2 * w3, axis=-1, keepdims=True) + b3[0]


if __name__ == "__main__":
    key = jax.random.PRNGKey(0)
    k_state, k_action, k_params = jax.random.split(key, 3)

    batch, state_dim, action_dim = 8, 16, 8
    state = jax.random.normal(k_state, (batch, state_dim), jnp.float32)
    action = jax.random.normal(k_action, (batch, action_dim), jnp.float32)
    params = init_params(k_params, state_dim, action_dim)

    out = jax.block_until_ready(qnetwork_forward(state, action, params))
    ref = jax.block_until_ready(qnetwork_reference(state, action, params))

    assert out.shape == (batch, 1), out.shape
    assert jnp.allclose(out, ref, atol=1e-3, rtol=1e-3), (out, ref)
    print("KERNEL_OK")
</pallas_src>

<mosaic_0001>
module attributes {stable_mosaic.version = 11 : i64} {
  func.func @qnetwork_kernel(%arg0: i32, %arg1: memref<128x16xf32, #tpu.memory_space<vmem>>, %arg2: memref<128x8xf32, #tpu.memory_space<vmem>>, %arg3: memref<32x256xbf16, #tpu.memory_space<vmem>>, %arg4: memref<1x256xf32, #tpu.memory_space<vmem>>, %arg5: memref<256x256xbf16, #tpu.memory_space<vmem>>, %arg6: memref<1x256xf32, #tpu.memory_space<vmem>>, %arg7: memref<1x256xf32, #tpu.memory_space<vmem>>, %arg8: memref<1xf32, #tpu.memory_space<smem>>, %arg9: memref<1x128xf32, #tpu.memory_space<vmem>>, %arg10: memref<128x32xbf16, #tpu.memory_space<vmem>>) attributes {dimension_semantics = [#tpu.dimension_semantics<parallel>], iteration_bounds = array<i64: 1>, scalar_prefetch = 0 : i64, scratch_operands = 1 : i64, tpu.core_type = #tpu.core_type<tc>, window_params = [{transform_indices = @transform_0, window_bounds = array<i64: 128, 16>}, {transform_indices = @transform_1, window_bounds = array<i64: 128, 8>}, {pipeline_mode = #tpu.pipeline_mode<synchronous>, transform_indices = @transform_2, window_bounds = array<i64: 32, 256>}, {pipeline_mode = #tpu.pipeline_mode<synchronous>, transform_indices = @transform_3, window_bounds = array<i64: 1, 256>}, {pipeline_mode = #tpu.pipeline_mode<synchronous>, transform_indices = @transform_4, window_bounds = array<i64: 256, 256>}, {pipeline_mode = #tpu.pipeline_mode<synchronous>, transform_indices = @transform_5, window_bounds = array<i64: 1, 256>}, {pipeline_mode = #tpu.pipeline_mode<synchronous>, transform_indices = @transform_6, window_bounds = array<i64: 1, 256>}, {transform_indices = @transform_7, window_bounds = array<i64: 1>}, {transform_indices = @transform_8, window_bounds = array<i64: 1, 128>}]} {
    %c0 = arith.constant 0 : index
    %c0_0 = arith.constant 0 : index
    %0 = vector.load %arg1[%c0, %c0_0] : memref<128x16xf32, #tpu.memory_space<vmem>>, vector<128x16xf32>
    %1 = arith.truncf %0 : vector<128x16xf32> to vector<128x16xbf16>
    %c0_1 = arith.constant 0 : index
    %c0_2 = arith.constant 0 : index
    %2 = vector.load %arg10[%c0_1, %c0_2] : memref<128x32xbf16, #tpu.memory_space<vmem>>, vector<128x16xbf16>
    tpu.vector_store %arg10[%c0_1, %c0_2], %1 {strides = array<i32>} : memref<128x32xbf16, #tpu.memory_space<vmem>>, vector<128x16xbf16>,
    %c0_3 = arith.constant 0 : index
    %c0_4 = arith.constant 0 : index
    %3 = vector.load %arg2[%c0_3, %c0_4] : memref<128x8xf32, #tpu.memory_space<vmem>>, vector<128x8xf32>
    %4 = arith.truncf %3 : vector<128x8xf32> to vector<128x8xbf16>
    %c0_5 = arith.constant 0 : index
    %c16 = arith.constant 16 : index
    %5 = vector.load %arg10[%c0_5, %c16] : memref<128x32xbf16, #tpu.memory_space<vmem>>, vector<128x8xbf16>
    tpu.vector_store %arg10[%c0_5, %c16], %4 {strides = array<i32>} : memref<128x32xbf16, #tpu.memory_space<vmem>>, vector<128x8xbf16>,
    %cst = arith.constant 0.000000e+00 : bf16
    %6 = vector.broadcast %cst : bf16 to vector<128x8xbf16>
    %c0_6 = arith.constant 0 : index
    %c24 = arith.constant 24 : index
    %7 = vector.load %arg10[%c0_6, %c24] : memref<128x32xbf16, #tpu.memory_space<vmem>>, vector<128x8xbf16>
    tpu.vector_store %arg10[%c0_6, %c24], %6 {strides = array<i32>} : memref<128x32xbf16, #tpu.memory_space<vmem>>, vector<128x8xbf16>,
    %c0_7 = arith.constant 0 : index
    %c0_8 = arith.constant 0 : index
    %8 = vector.load %arg10[%c0_7, %c0_8] : memref<128x32xbf16, #tpu.memory_space<vmem>>, vector<128x32xbf16>
    %c0_9 = arith.constant 0 : index
    %c0_10 = arith.constant 0 : index
    %9 = vector.load %arg3[%c0_9, %c0_10] : memref<32x256xbf16, #tpu.memory_space<vmem>>, vector<32x256xbf16>
    %cst_11 = arith.constant dense<0.000000e+00> : vector<128x256xf32>
    %10 = tpu.matmul %8, %9, %cst_11 {dimension_numbers = #tpu.dot_dimension_numbers<[1], [0], [0], [1], [0, 0, 1, 1], [], []>} : vector<128x32xbf16>, vector<32x256xbf16>, vector<128x256xf32> -> vector<128x256xf32>
    %c0_12 = arith.constant 0 : index
    %c0_13 = arith.constant 0 : index
    %11 = vector.load %arg4[%c0_12, %c0_13] : memref<1x256xf32, #tpu.memory_space<vmem>>, vector<1x256xf32>
    %12 = vector.broadcast %11 : vector<1x256xf32> to vector<128x256xf32>
    %13 = arith.addf %10, %12 : vector<128x256xf32>
    %cst_14 = arith.constant 0.000000e+00 : f32
    %14 = vector.broadcast %cst_14 : f32 to vector<128x256xf32>
    %15 = arith.maximumf %13, %14 : vector<128x256xf32>
    %16 = arith.truncf %15 : vector<128x256xf32> to vector<128x256xbf16>
    %c0_15 = arith.constant 0 : index
    %c0_16 = arith.constant 0 : index
    %17 = vector.load %arg5[%c0_15, %c0_16] : memref<256x256xbf16, #tpu.memory_space<vmem>>, vector<256x256xbf16>
    %cst_17 = arith.constant dense<0.000000e+00> : vector<128x256xf32>
    %18 = tpu.matmul %16, %17, %cst_17 {dimension_numbers = #tpu.dot_dimension_numbers<[1], [0], [0], [1], [0, 0, 1, 1], [], []>} : vector<128x256xbf16>, vector<256x256xbf16>, vector<128x256xf32> -> vector<128x256xf32>
    %c0_18 = arith.constant 0 : index
    %c0_19 = arith.constant 0 : index
    %19 = vector.load %arg6[%c0_18, %c0_19] : memref<1x256xf32, #tpu.memory_space<vmem>>, vector<1x256xf32>
    %20 = vector.broadcast %19 : vector<1x256xf32> to vector<128x256xf32>
    %21 = arith.addf %18, %20 : vector<128x256xf32>
    %cst_20 = arith.constant 0.000000e+00 : f32
    %22 = vector.broadcast %cst_20 : f32 to vector<128x256xf32>
    %23 = arith.maximumf %21, %22 : vector<128x256xf32>
    %c0_21 = arith.constant 0 : index
    %c0_22 = arith.constant 0 : index
    %24 = vector.load %arg7[%c0_21, %c0_22] : memref<1x256xf32, #tpu.memory_space<vmem>>, vector<1x256xf32>
    %25 = vector.broadcast %24 : vector<1x256xf32> to vector<128x256xf32>
    %26 = arith.mulf %23, %25 : vector<128x256xf32>
    %cst_23 = arith.constant dense<0.000000e+00> : vector<128xf32>
    %27 = vector.multi_reduction <add>, %26, %cst_23 [1] : vector<128x256xf32> to vector<128xf32>
    %c0_24 = arith.constant 0 : index
    %28 = memref.load %arg8[%c0_24] : memref<1xf32, #tpu.memory_space<smem>>
    %29 = vector.broadcast %28 : f32 to vector<128xf32>
    %30 = arith.addf %27, %29 : vector<128xf32>
    %31 = vector.shape_cast %30 : vector<128xf32> to vector<1x128xf32>
    %c0_25 = arith.constant 0 : index
    %c0_26 = arith.constant 0 : index
    %32 = vector.load %arg9[%c0_25, %c0_26] : memref<1x128xf32, #tpu.memory_space<vmem>>, vector<1x128xf32>
    tpu.vector_store %arg9[%c0_25, %c0_26], %31 {strides = array<i32>} : memref<1x128xf32, #tpu.memory_space<vmem>>, vector<1x128xf32>,
    return
  }
  func.func @transform_0(%arg0: i32) -> (i32, i32) {
    %c0_i32 = arith.constant 0 : i32
    %c0_i32_0 = arith.constant 0 : i32
    return %arg0, %c0_i32 : i32, i32
  }
  func.func @transform_1(%arg0: i32) -> (i32, i32) {
    %c0_i32 = arith.constant 0 : i32
    %c0_i32_0 = arith.constant 0 : i32
    return %arg0, %c0_i32 : i32, i32
  }
  func.func @transform_2(%arg0: i32) -> (i32, i32) {
    %c0_i32 = arith.constant 0 : i32
    %c0_i32_0 = arith.constant 0 : i32
    %c0_i32_1 = arith.constant 0 : i32
    return %c0_i32, %c0_i32_0 : i32, i32
  }
  func.func @transform_3(%arg0: i32) -> (i32, i32) {
    %c0_i32 = arith.constant 0 : i32
    %c0_i32_0 = arith.constant 0 : i32
    %c0_i32_1 = arith.constant 0 : i32
    return %c0_i32, %c0_i32_0 : i32, i32
  }
  func.func @transform_4(%arg0: i32) -> (i32, i32) {
    %c0_i32 = arith.constant 0 : i32
    %c0_i32_0 = arith.constant 0 : i32
    %c0_i32_1 = arith.constant 0 : i32
    return %c0_i32, %c0_i32_0 : i32, i32
  }
  func.func @transform_5(%arg0: i32) -> (i32, i32) {
    %c0_i32 = arith.constant 0 : i32
    %c0_i32_0 = arith.constant 0 : i32
    %c0_i32_1 = arith.constant 0 : i32
    return %c0_i32, %c0_i32_0 : i32, i32
  }
  func.func @transform_6(%arg0: i32) -> (i32, i32) {
    %c0_i32 = arith.constant 0 : i32
    %c0_i32_0 = arith.constant 0 : i32
    %c0_i32_1 = arith.constant 0 : i32
    return %c0_i32, %c0_i32_0 : i32, i32
  }
  func.func @transform_7(%arg0: i32) -> i32 {
    %c0_i32 = arith.constant 0 : i32
    %c0_i32_0 = arith.constant 0 : i32
    return %c0_i32 : i32
  }
  func.func @transform_8(%arg0: i32) -> (i32, i32) {
    %c0_i32 = arith.constant 0 : i32
    %c0_i32_0 = arith.constant 0 : i32
    return %c0_i32, %arg0 : i32, i32
  }
}

</mosaic_0001>

<bundles_post_ra>
// kernel: tpu_custom_call.1
= control target key start
LH: loop header
LB: loop body
LE: loop exit
PB: predicated region body
PF: predicated region fallthrough
CT: control target
= control target key end

     0   :  { %v1126_v10 = vmov 0   ;;  %s1127_s21 = smov 16   ;;  %vm56_vm0 = vcmask 130048   ;;  %s1745_s0 = inlined_call_operand.vmem [shape: f32[128,16], index: 0, kind: input, shape index: {}]   ;;  %s1746_s1 = inlined_call_operand.vmem [shape: f32[128,8], index: 1, kind: input, shape index: {}]   ;;  %s1747_s2 = inlined_call_operand.vmem [shape: bf16[32,256], index: 2, kind: input, shape index: {}]   ;;  %s1748_s3 = inlined_call_operand.vmem [shape: f32[1,256], index: 3, kind: input, shape index: {}]   ;;  %s1749_s4 = inlined_call_operand.vmem [shape: bf16[256,256], index: 4, kind: input, shape index: {}]   ;;  %s1750_s5 = inlined_call_operand.vmem [shape: f32[1,256], index: 5, kind: input, shape index: {}]   ;;  %s1751_s6 = inlined_call_operand.vmem [shape: f32[1,256], index: 6, kind: input, shape index: {}]   ;;  %s1752_s7 = inlined_call_operand.<no memory space> [shape: f32[1], index: 7, kind: input, shape index: {}]   ;;  %s1753_s8 = inlined_call_operand.hbm [shape: f32[1,128], index: 8, kind: output, shape index: {}]  }
   0x1   :  { %v65_v0 = vld [vmem:[%s1746_s1] sm:$0xff]  ;;  %v66_v1 = vld [vmem:[%s1746_s1 + $0x8] sm:$0xff]  ;;  %v67_v2 = vld [vmem:[%s1746_s1 + $0x10] sm:$0xff]  ;;  %240 = vmatprep.mubr.bf16.mxu0 %v1126_v10 }
   0x2   :  { %v81_v3 = vpack.c.bf16 %v66_v1, %v65_v0  ;;  %v68_v4 = vld [vmem:[%s1746_s1 + $0x18] sm:$0xff]  ;;  %v69_v5 = vld [vmem:[%s1746_s1 + $0x20] sm:$0xff]  ;;  %v70_v6 = vld [vmem:[%s1746_s1 + $0x28] sm:$0xff] }
   0x3   :  { %v83_v7 = vpack.c.bf16 %v70_v6, %v69_v5  ;;  %v71_v8 = vld [vmem:[%s1746_s1 + $0x30] sm:$0xff]  ;;  %v72_v9 = vld [vmem:[%s1746_s1 + $0x38] sm:$0xff]  ;;  %v82_v11 = vpack.c.bf16 %v68_v4, %v67_v2  ;;  %v73_v13 = vld [vmem:[%s1746_s1 + $0x40] sm:$0xff] }
   0x4   :  { %97 = vrot.lane.b32.xlu0 %v81_v3, %s1127_s21  ;;  %v84_v12 = vpack.c.bf16 %v72_v9, %v71_v8  ;;  %v74_v14 = vld [vmem:[%s1746_s1 + $0x48] sm:$0xff]  ;;  %v75_v15 = vld [vmem:[%s1746_s1 + $0x50] sm:$0xff]  ;;  %v76_v16 = vld [vmem:[%s1746_s1 + $0x58] sm:$0xff] }
   0x5   :  { %101 = vrot.lane.b32.xlu1 %v83_v7, %s1127_s21  ;;  %v32_v17 = vld [vmem:[%s1745_s0] sm:$0xff]  ;;  %v33_v18 = vld [vmem:[%s1745_s0 + $0x8] sm:$0xff]  ;;  %v85_v23 = vpack.c.bf16 %v74_v14, %v73_v13  ;;  %v79_v24 = vld [vmem:[%s1746_s1 + $0x70] sm:$0xff]  ;;  %v86_v27 = vpack.c.bf16 %v76_v16, %v75_v15 }
   0x6   :  { %v77_v19 = vld [vmem:[%s1746_s1 + $0x60] sm:$0xff]  ;;  %v78_v20 = vld [vmem:[%s1746_s1 + $0x68] sm:$0xff]  ;;  %v48_v21 = vpack.c.bf16 %v33_v18, %v32_v17  ;;  %v80_v25 = vld [vmem:[%s1746_s1 + $0x78] sm:$0xff] }
   0x7   :  { %v1048_v22 = vld [vmem:[%s1747_s2 + $0x4] ss:$8 sps:$4 sm:$0xff]   ;;  %v1050_v26 = vld [vmem:[%s1747_s2] ss:$8 sps:$4 sm:$0xff]   ;;  %v1051_v28 = vld [vmem:[%s1747_s2 + $0x14] ss:$8 sps:$4 sm:$0xff]   ;;  %v87_v38 = vpack.c.bf16 %v78_v20, %v77_v19  ;;  %v88_v40 = vpack.c.bf16 %v80_v25, %v79_v24 }
   0x8   :  { %99 = vrot.lane.b32.xlu0 %v82_v11, %s1127_s21  ;;  %57 = vst.msk [vmem:[#allocation2] sm:$0xff] %vm56_vm0, %v48_v21  ;;  %208 = vmatprep.subr.bf16.mxu0 %v1048_v22  ;;  %v1053_v29 = vld [vmem:[%s1747_s2 + $0x10] ss:$8 sps:$4 sm:$0xff]   ;;  %v36_v32 = vld [vmem:[%s1745_s0 + $0x20] sm:$0xff]  ;;  %v37_v33 = vld [vmem:[%s1745_s0 + $0x28] sm:$0xff] }
   0x9   :  { %103 = vrot.lane.b32.xlu1 %v84_v12, %s1127_s21  ;;  %v34_v30 = vld [vmem:[%s1745_s0 + $0x10] sm:$0xff]  ;;  %209 = vmatpush1.bf16.msra.mxu0 %v1050_v26  ;;  %v35_v31 = vld [vmem:[%s1745_s0 + $0x18] sm:$0xff]  ;;  %v50_v35 = vpack.c.bf16 %v37_v33, %v36_v32  ;;  %v40_v41 = vld [vmem:[%s1745_s0 + $0x40] sm:$0xff] }
   0xa   :  { %210 = vmatprep.subr.bf16.mxu0 %v1051_v28  ;;  %v49_v34 = vpack.c.bf16 %v35_v31, %v34_v30  ;;  %v38_v36 = vld [vmem:[%s1745_s0 + $0x30] sm:$0xff]  ;;  %v39_v37 = vld [vmem:[%s1745_s0 + $0x38] sm:$0xff]  ;;  %v41_v42 = vld [vmem:[%s1745_s0 + $0x48] sm:$0xff] }
   0xb   :  { %v51_v39 = vpack.c.bf16 %v39_v37, %v38_v36  ;;  %59 = vst.msk [vmem:[#allocation2 + $0x10] sm:$0xff] %vm56_vm0, %v50_v35  ;;  %v52_v43 = vpack.c.bf16 %v41_v42, %v40_v41 }
   0xc   :  { %105 = vrot.lane.b32.xlu0 %v85_v23, %s1127_s21  ;;  %58 = vst.msk [vmem:[#allocation2 + $0x8] sm:$0xff] %vm56_vm0, %v49_v34 }
   0xd   :  { %107 = vrot.lane.b32.xlu1 %v86_v27, %s1127_s21  ;;  %211 = vmatpush1.bf16.msra.mxu0 %v1053_v29  ;;  %60 = vst.msk [vmem:[#allocation2 + $0x18] sm:$0xff] %vm56_vm0, %v51_v39  ;;  %61 = vst.msk [vmem:[#allocation2 + $0x20] sm:$0xff] %vm56_vm0, %v52_v43 }
  0x10   :  { %109 = vrot.lane.b32.xlu0 %v87_v38, %s1127_s21 }
  0x11   :  { %111 = vrot.lane.b32.xlu1 %v88_v40, %s1127_s21 }
  0x12   :  { %14 = vsyncpa [#allocation5], 0  ;;  %v42_v44 = vld [vmem:[%s1745_s0 + $0x50] sm:$0xff]  ;;  %v43_v45 = vld [vmem:[%s1745_s0 + $0x58] sm:$0xff]  ;;  %vm121_vm1 = vcmask 195712   ;;  %vm130_vm2 = vcmask 261312   ;;  %v153_v37 = vlaneseq }
  0x13   :  { %v53_v46 = vpack.c.bf16 %v43_v45, %v42_v44  ;;  %v44_v47 = vld [vmem:[%s1745_s0 + $0x60] sm:$0xff]  ;;  %v45_v48 = vld [vmem:[%s1745_s0 + $0x68] sm:$0xff]  ;;  %v46_v50 = vld [vmem:[%s1745_s0 + $0x70] sm:$0xff]  ;;  %vm183_vm3 = vcmask 261120   ;;  %vm855_vm4 = vcmask 130112   ;;  %vm874_vm5 = vcmask 326912  }
  0x14   :  { %v54_v49 = vpack.c.bf16 %v45_v48, %v44_v47  ;;  %v47_v51 = vld [vmem:[%s1745_s0 + $0x78] sm:$0xff]  ;;  %v1056_v53 = vld [vmem:[%s1749_s4 + $0x4] ss:$8 sps:$4 sm:$0xff]   ;;  %v1305_v54 = vld [vmem:[%s1749_s4] ss:$8 sps:$4 sm:$0xff]   ;;  %v1543_v38 = vshrl.u32 %v153_v37, 7 }
  0x15   :  { %62 = vst.msk [vmem:[#allocation2 + $0x28] sm:$0xff] %vm56_vm0, %v53_v46  ;;  %v55_v52 = vpack.c.bf16 %v47_v51, %v46_v50  ;;  %573 = vmatprep.subr.bf16.mxu0 %v1056_v53  ;;  %v1310_v55 = vld [vmem:[%s1749_s4 + $0x14] ss:$8 sps:$4 sm:$0xff]   ;;  %1013 = vmatprep.subr.bf16.mxu1 %v1056_v53  ;;  %v1317_v56 = vld [vmem:[%s1749_s4 + $0x10] ss:$8 sps:$4 sm:$0xff]   ;;  %vm881_vm6 = vcmask 392512  }
  0x16   :  { %63 = vst.msk [vmem:[#allocation2 + $0x30] sm:$0xff] %vm56_vm0, %v54_v49  ;;  %1029 = vmatpush1.bf16.msra.mxu1 %v1305_v54  ;;  %v1322_v57 = vld [vmem:[%s1749_s4 + $0x24] ss:$8 sps:$4 sm:$0xff]   ;;  %v1329_v58 = vld [vmem:[%s1749_s4 + $0x20] ss:$8 sps:$4 sm:$0xff]   ;;  %v1546_v39 = vsub.s32 0, %v1543_v38 }
  0x17   :  { %64 = vst.msk [vmem:[#allocation2 + $0x38] sm:$0xff] %vm56_vm0, %v55_v52  ;;  %1014 = vmatprep.subr.bf16.mxu1 %v1310_v55  ;;  %v1334_v59 = vld [vmem:[%s1749_s4 + $0x34] ss:$8 sps:$4 sm:$0xff]   ;;  %v1341_v60 = vld [vmem:[%s1749_s4 + $0x30] ss:$8 sps:$4 sm:$0xff]   ;;  %v1552_v41 = vsub.s32 1, %v1543_v38 }
  0x18   :  { %v1346_v61 = vld [vmem:[%s1749_s4 + $0x44] ss:$8 sps:$4 sm:$0xff]   ;;  %v1353_v62 = vld [vmem:[%s1749_s4 + $0x40] ss:$8 sps:$4 sm:$0xff]   ;;  %v1358_v63 = vld [vmem:[%s1749_s4 + $0x54] ss:$8 sps:$4 sm:$0xff]  }
  0x19   :  { %v1365_v0 = vld [vmem:[%s1749_s4 + $0x50] ss:$8 sps:$4 sm:$0xff]   ;;  %v1370_v1 = vld [vmem:[%s1749_s4 + $0x64] ss:$8 sps:$4 sm:$0xff]   ;;  %v1377_v2 = vld [vmem:[%s1749_s4 + $0x60] ss:$8 sps:$4 sm:$0xff]  }
  0x1a   :  { %1030 = vmatpush1.bf16.msra.mxu1 %v1317_v56  ;;  %v1382_v3 = vld [vmem:[%s1749_s4 + $0x74] ss:$8 sps:$4 sm:$0xff]   ;;  %v1389_v4 = vld [vmem:[%s1749_s4 + $0x70] ss:$8 sps:$4 sm:$0xff]   ;;  %v1394_v5 = vld [vmem:[%s1749_s4 + $0x84] ss:$8 sps:$4 sm:$0xff]  }
  0x1b   :  { %1015 = vmatprep.subr.bf16.mxu1 %v1322_v57  ;;  %v1401_v6 = vld [vmem:[%s1749_s4 + $0x80] ss:$8 sps:$4 sm:$0xff]   ;;  %v1406_v7 = vld [vmem:[%s1749_s4 + $0x94] ss:$8 sps:$4 sm:$0xff]   ;;  %v1413_v8 = vld [vmem:[%s1749_s4 + $0x90] ss:$8 sps:$4 sm:$0xff]  }
  0x1c   :  { %v1418_v9 = vld [vmem:[%s1749_s4 + $0xa4] ss:$8 sps:$4 sm:$0xff]   ;;  %v1425_v11 = vld [vmem:[%s1749_s4 + $0xa0] ss:$8 sps:$4 sm:$0xff]   ;;  %v1430_v12 = vld [vmem:[%s1749_s4 + $0xb4] ss:$8 sps:$4 sm:$0xff]  }
  0x1d   :  { %v1437_v13 = vld [vmem:[%s1749_s4 + $0xb0] ss:$8 sps:$4 sm:$0xff]   ;;  %v1442_v14 = vld [vmem:[%s1749_s4 + $0xc4] ss:$8 sps:$4 sm:$0xff]   ;;  %v1449_v15 = vld [vmem:[%s1749_s4 + $0xc0] ss:$8 sps:$4 sm:$0xff]  }
  0x1e   :  { %1031 = vmatpush1.bf16.msra.mxu1 %v1329_v58  ;;  %v1454_v16 = vld [vmem:[%s1749_s4 + $0xd4] ss:$8 sps:$4 sm:$0xff]   ;;  %v1461_v17 = vld [vmem:[%s1749_s4 + $0xd0] ss:$8 sps:$4 sm:$0xff]   ;;  %v1098_v34 = vld [vmem:[%s1749_s4 + $0xe4] ss:$8 sps:$4 sm:$0xff]  }
  0x1f   :  { %1016 = vmatprep.subr.bf16.mxu1 %v1334_v59  ;;  %v1096_v35 = vld [vmem:[%s1749_s4 + $0xe0] ss:$8 sps:$4 sm:$0xff]   ;;  %v1099_v36 = vld [vmem:[%s1749_s4 + $0xf0] ss:$8 sps:$4 sm:$0xff]   ;;  %vm888_vm7 = vcmask 458112   ;;  %vm895_vm8 = vcmask 523712  }
  0x20   :  { %v151_v40 = vld [vmem:[%s1748_s3] sm:$0x3]  ;;  %vm902_vm9 = vcmask 589312   ;;  %vm909_vm10 = vcmask 654912   ;;  %vm916_vm11 = vcmask 720512   ;;  %vm923_vm12 = vcmask 786112  }
  0x21   :  { %v1555_v42 = vrot.slane %v151_v40, %v1546_v39  ;;  %v1558_v43 = vrot.slane %v151_v40, %v1552_v41  ;;  %vm930_vm13 = vcmask 851712   ;;  %vm937_vm14 = vcmask 917312  }
  0x22   :  { %1032 = vmatpush1.bf16.msra.mxu1 %v1341_v60  ;;  %vm944_vm15 = vcmask 982912   ;;  %vm951_vm0 = vcmask 1048512  }
  0x23   :  { %1017 = vmatprep.subr.bf16.mxu1 %v1346_v61 }
  0x26   :  { %1033 = vmatpush1.bf16.msra.mxu1 %v1353_v62 }
  0x27   :  { %1018 = vmatprep.subr.bf16.mxu1 %v1358_v63 }
  0x2a   :  { %1034 = vmatpush1.bf16.msra.mxu1 %v1365_v0 }
  0x2b   :  { %1019 = vmatprep.subr.bf16.mxu1 %v1370_v1 }
  0x2e   :  { %1035 = vmatpush1.bf16.msra.mxu1 %v1377_v2 }
  0x2f   :  { %1020 = vmatprep.subr.bf16.mxu1 %v1382_v3 }
  0x32   :  { %1036 = vmatpush1.bf16.msra.mxu1 %v1389_v4 }
  0x33   :  { %1021 = vmatprep.subr.bf16.mxu1 %v1394_v5 }
  0x36   :  { %1037 = vmatpush1.bf16.msra.mxu1 %v1401_v6 }
  0x37   :  { %1022 = vmatprep.subr.bf16.mxu1 %v1406_v7 }
  0x3a   :  { %1038 = vmatpush1.bf16.msra.mxu1 %v1413_v8 }
  0x3b   :  { %1023 = vmatprep.subr.bf16.mxu1 %v1418_v9 }
  0x3e   :  { %1039 = vmatpush1.bf16.msra.mxu1 %v1425_v11 }
  0x3f   :  { %1024 = vmatprep.subr.bf16.mxu1 %v1430_v12 }
  0x42   :  { %1040 = vmatpush1.bf16.msra.mxu1 %v1437_v13 }
  0x43   :  { %1025 = vmatprep.subr.bf16.mxu1 %v1442_v14 }
  0x46   :  { %1041 = vmatpush1.bf16.msra.mxu1 %v1449_v15 }
  0x47   :  { %1026 = vmatprep.subr.bf16.mxu1 %v1454_v16 }
  0x4a   :  { %1042 = vmatpush1.bf16.msra.mxu1 %v1461_v17 }
  0x4b   :  { %1027 = vmatprep.subr.bf16.mxu1 %v1098_v34 }
  0x4e   :  { %1043 = vmatpush1.bf16.msra.mxu1 %v1096_v35 }
  0x76   :  { %v98_v18 = vpop.permute.xlu0 %97 }
  0x77   :  { %122 = vst.msk [vmem:[#allocation2] sm:$0xff] %vm121_vm1, %v98_v18  ;;  %v102_v19 = vpop.permute.xlu1 %101 }
  0x78   :  { %131 = vst.msk [vmem:[#allocation2] sm:$0xff] %vm130_vm2, %v1126_v10 }
  0x79   :  { %124 = vst.msk [vmem:[#allocation2 + $0x10] sm:$0xff] %vm121_vm1, %v102_v19 }
  0x7a   :  { %133 = vst.msk [vmem:[#allocation2 + $0x10] sm:$0xff] %vm130_vm2, %v1126_v10  ;;  %v100_v20 = vpop.permute.xlu0 %99 }
  0x7b   :  { %123 = vst.msk [vmem:[#allocation2 + $0x8] sm:$0xff] %vm121_vm1, %v100_v20  ;;  %v104_v21 = vpop.permute.xlu1 %103 }
  0x7c   :  { %132 = vst.msk [vmem:[#allocation2 + $0x8] sm:$0xff] %vm130_vm2, %v1126_v10 }
  0x7d   :  { %125 = vst.msk [vmem:[#allocation2 + $0x18] sm:$0xff] %vm121_vm1, %v104_v21 }
  0x7e   :  { %134 = vst.msk [vmem:[#allocation2 + $0x18] sm:$0xff] %vm130_vm2, %v1126_v10  ;;  %v106_v22 = vpop.permute.xlu0 %105 }
  0x7f   :  { %v139_v23 = vld [vmem:[#allocation2] sm:$0xff]  ;;  %126 = vst.msk [vmem:[#allocation2 + $0x20] sm:$0xff] %vm121_vm1, %v106_v22  ;;  %v108_v24 = vpop.permute.xlu1 %107 }
  0x80   :  { %973 = vmatmul.mubr.msk.bf16.vlgmr.msra.gmra.mrb[0].mxu0 %vm183_vm3, %v139_v23  ;;  %135 = vst.msk [vmem:[#allocation2 + $0x20] sm:$0xff] %vm130_vm2, %v1126_v10 }
  0x81   :  { %127 = vst.msk [vmem:[#allocation2 + $0x28] sm:$0xff] %vm121_vm1, %v108_v24  ;;  %250 = vmatprep.mubr.bf16.mxu0 %v1126_v10  ;;  %574 = vmatpush1.bf16.msra.mxu0 %v1305_v54  ;;  %v141_v28 = vld [vmem:[#allocation2 + $0x10] sm:$0xff] }
  0x82   :  { %136 = vst.msk [vmem:[#allocation2 + $0x28] sm:$0xff] %vm130_vm2, %v1126_v10  ;;  %v110_v25 = vpop.permute.xlu0 %109  ;;  %575 = vmatprep.subr.bf16.mxu0 %v1310_v55 }
  0x83   :  { %128 = vst.msk [vmem:[#allocation2 + $0x30] sm:$0xff] %vm121_vm1, %v110_v25  ;;  %v112_v26 = vpop.permute.xlu1 %111  ;;  %v140_v27 = vld [vmem:[#allocation2 + $0x8] sm:$0xff] }
  0x84   :  { %137 = vst.msk [vmem:[#allocation2 + $0x30] sm:$0xff] %vm130_vm2, %v1126_v10 }
  0x85   :  { %129 = vst.msk [vmem:[#allocation2 + $0x38] sm:$0xff] %vm121_vm1, %v112_v26  ;;  %576 = vmatpush1.bf16.msra.mxu0 %v1317_v56  ;;  %v142_v29 = vld [vmem:[#allocation2 + $0x18] sm:$0xff] }
  0x86   :  { %138 = vst.msk [vmem:[#allocation2 + $0x38] sm:$0xff] %vm130_vm2, %v1126_v10  ;;  %577 = vmatprep.subr.bf16.mxu0 %v1322_v57 }
  0x87   :  { %v143_v30 = vld [vmem:[#allocation2 + $0x20] sm:$0xff] }
  0x88   :  { %974 = vmatmul.mubr.msk.bf16.gmra.mrb[4].mxu0 %vm183_vm3, %v140_v27 }
  0x89   :  { %260 = vmatprep.mubr.bf16.mxu0 %v1126_v10  ;;  %578 = vmatpush1.bf16.msra.mxu0 %v1329_v58  ;;  %v144_v31 = vld [vmem:[#allocation2 + $0x28] sm:$0xff] }
  0x8a   :  { %579 = vmatprep.subr.bf16.mxu0 %v1334_v59 }
  0x8b   :  { %v145_v32 = vld [vmem:[#allocation2 + $0x30] sm:$0xff] }
  0x8d   :  { %580 = vmatpush1.bf16.msra.mxu0 %v1341_v60  ;;  %v146_v33 = vld [vmem:[#allocation2 + $0x38] sm:$0xff] }
  0x8e   :  { %581 = vmatprep.subr.bf16.mxu0 %v1346_v61 }
  0x90   :  { %975 = vmatmul.mubr.msk.bf16.gmra.mrb[8].mxu0 %vm183_vm3, %v141_v28 }
  0x91   :  { %270 = vmatprep.mubr.bf16.mxu0 %v1126_v10  ;;  %582 = vmatpush1.bf16.msra.mxu0 %v1353_v62 }
  0x92   :  { %583 = vmatprep.subr.bf16.mxu0 %v1358_v63 }
  0x95   :  { %584 = vmatpush1.bf16.msra.mxu0 %v1365_v0 }
  0x96   :  { %585 = vmatprep.subr.bf16.mxu0 %v1370_v1 }
  0x98   :  { %976 = vmatmul.mubr.msk.bf16.gmra.mrb[12].mxu0 %vm183_vm3, %v142_v29 }
  0x99   :  { %280 = vmatprep.mubr.bf16.mxu0 %v1126_v10  ;;  %586 = vmatpush1.bf16.msra.mxu0 %v1377_v2 }
  0x9a   :  { %587 = vmatprep.subr.bf16.mxu0 %v1382_v3 }
  0x9d   :  { %588 = vmatpush1.bf16.msra.mxu0 %v1389_v4 }
  0x9e   :  { %589 = vmatprep.subr.bf16.mxu0 %v1394_v5 }
  0xa0   :  { %977 = vmatmul.mubr.msk.bf16.gmra.mrb[16].mxu0 %vm183_vm3, %v143_v30 }
  0xa1   :  { %290 = vmatprep.mubr.bf16.mxu0 %v1126_v10  ;;  %590 = vmatpush1.bf16.msra.mxu0 %v1401_v6 }
  0xa2   :  { %591 = vmatprep.subr.bf16.mxu0 %v1406_v7 }
  0xa5   :  { %592 = vmatpush1.bf16.msra.mxu0 %v1413_v8 }
  0xa6   :  { %593 = vmatprep.subr.bf16.mxu0 %v1418_v9 }
  0xa8   :  { %978 = vmatmul.mubr.msk.bf16.gmra.mrb[20].mxu0 %vm183_vm3, %v144_v31 }
  0xa9   :  { %300 = vmatprep.mubr.bf16.mxu0 %v1126_v10  ;;  %594 = vmatpush1.bf16.msra.mxu0 %v1425_v11 }
  0xaa   :  { %595 = vmatprep.subr.bf16.mxu0 %v1430_v12 }
  0xad   :  { %596 = vmatpush1.bf16.msra.mxu0 %v1437_v13 }
  0xae   :  { %597 = vmatprep.subr.bf16.mxu0 %v1442_v14 }
  0xb0   :  { %979 = vmatmul.mubr.msk.bf16.gmra.mrb[24].mxu0 %vm183_vm3, %v145_v32 }
  0xb1   :  { %310 = vmatprep.mubr.bf16.mxu0 %v1126_v10  ;;  %598 = vmatpush1.bf16.msra.mxu0 %v1449_v15  ;;  %v1101_v10 = vld [vmem:[%s1749_s4 + $0xf4] ss:$8 sps:$4 sm:$0xff]  }
  0xb2   :  { %599 = vmatprep.subr.bf16.mxu0 %v1454_v16  ;;  %1028 = vmatprep.subr.bf16.mxu1 %v1101_v10 }
  0xb3   :  { %1044 = vmatpush1.bf16.msra.mxu1 %v1099_v36 }
  0xb5   :  { %600 = vmatpush1.bf16.msra.mxu0 %v1461_v17 }
  0xb6   :  { %601 = vmatprep.subr.bf16.mxu0 %v1098_v34 }
  0xb8   :  { %980 = vmatmul.mubr.msk.bf16.gmra.mrb[28].mxu0 %vm183_vm3, %v146_v33 }
  0xb9   :  { %602 = vmatpush1.bf16.msra.mxu0 %v1096_v35 }
  0xba   :  { %603 = vmatprep.subr.bf16.mxu0 %v1101_v10 }
  0xbd   :  { %604 = vmatpush1.bf16.msra.mxu0 %v1099_v36 }
 0x153   :  { %v242_v44 = vpop.f32.mrb[0].mxu0 }
 0x154   :  { %v243_v45 = vadd.f32 %v242_v44, %v1555_v42  ;;  %v244_v46 = vpop.f32.mrb[1].mxu0 }
 0x155   :  { %v245_v47 = vadd.f32 %v244_v46, %v1558_v43  ;;  %v246_v48 = vpop.f32.mrb[2].mxu0 }
 0x156   :  { %v247_v49 = vadd.f32 %v246_v48, %v1555_v42  ;;  %v248_v50 = vpop.f32.mrb[3].mxu0  ;;  %v321_v52 = vmax.f32 %v243_v45, 0.0 }
 0x157   :  { %v249_v51 = vadd.f32 %v248_v50, %v1558_v43  ;;  %v322_v54 = vmax.f32 %v245_v47, 0.0 }
 0x158   :  { %v323_v53 = vmax.f32 %v247_v49, 0.0 }
 0x159   :  { %v324_v55 = vmax.f32 %v249_v51, 0.0 }
 0x15a   :  { %v353_v56 = vpack.c.bf16 %v323_v53, %v321_v52 }
 0x15b   :  { %v354_v57 = vpack.c.bf16 %v324_v55, %v322_v54  ;;  %v252_v58 = vpop.f32.mrb[4].mxu0 }
 0x15c   :  { %v253_v59 = vadd.f32 %v252_v58, %v1555_v42  ;;  %v254_v60 = vpop.f32.mrb[5].mxu0 }
 0x15d   :  { %v255_v61 = vadd.f32 %v254_v60, %v1558_v43  ;;  %v256_v62 = vpop.f32.mrb[6].mxu0  ;;  %605 = vmatprep.mubr.bf16.mxu0 %v354_v57 }
 0x15e   :  { %v257_v63 = vadd.f32 %v256_v62, %v1555_v42  ;;  %v258_v0 = vpop.f32.mrb[7].mxu0  ;;  %606 = vmatmul.mubr.bf16.vlgmr.msra.gmra.mrb[32].mxu0 %v353_v56  ;;  %v325_v2 = vmax.f32 %v253_v59, 0.0 }
 0x15f   :  { %v259_v1 = vadd.f32 %v258_v0, %v1558_v43  ;;  %v326_v4 = vmax.f32 %v255_v61, 0.0 }
 0x160   :  { %v327_v3 = vmax.f32 %v257_v63, 0.0 }
 0x161   :  { %v328_v5 = vmax.f32 %v259_v1, 0.0 }
 0x162   :  { %v355_v6 = vpack.c.bf16 %v327_v3, %v325_v2 }
 0x163   :  { %v356_v7 = vpack.c.bf16 %v328_v5, %v326_v4  ;;  %v262_v8 = vpop.f32.mrb[8].mxu0 }
 0x164   :  { %v263_v9 = vadd.f32 %v262_v8, %v1555_v42  ;;  %v264_v11 = vpop.f32.mrb[9].mxu0 }
 0x165   :  { %v265_v12 = vadd.f32 %v264_v11, %v1558_v43  ;;  %v266_v13 = vpop.f32.mrb[10].mxu0  ;;  %615 = vmatprep.mubr.bf16.mxu0 %v356_v7 }
 0x166   :  { %v267_v14 = vadd.f32 %v266_v13, %v1555_v42  ;;  %v268_v15 = vpop.f32.mrb[11].mxu0  ;;  %616 = vmatmul.mubr.bf16.gmra.mrb[36].mxu0 %v355_v6  ;;  %v329_v17 = vmax.f32 %v263_v9, 0.0 }
 0x167   :  { %v269_v16 = vadd.f32 %v268_v15, %v1558_v43  ;;  %v330_v19 = vmax.f32 %v265_v12, 0.0 }
 0x168   :  { %v331_v18 = vmax.f32 %v267_v14, 0.0 }
 0x169   :  { %v332_v20 = vmax.f32 %v269_v16, 0.0 }
 0x16a   :  { %v357_v21 = vpack.c.bf16 %v331_v18, %v329_v17 }
 0x16b   :  { %v358_v22 = vpack.c.bf16 %v332_v20, %v330_v19  ;;  %v272_v23 = vpop.f32.mrb[12].mxu0 }
 0x16c   :  { %v273_v24 = vadd.f32 %v272_v23, %v1555_v42  ;;  %v274_v25 = vpop.f32.mrb[13].mxu0 }
 0x16d   :  { %v275_v26 = vadd.f32 %v274_v25, %v1558_v43  ;;  %v276_v27 = vpop.f32.mrb[14].mxu0  ;;  %625 = vmatprep.mubr.bf16.mxu0 %v358_v22 }
 0x16e   :  { %v277_v28 = vadd.f32 %v276_v27, %v1555_v42  ;;  %v278_v29 = vpop.f32.mrb[15].mxu0  ;;  %626 = vmatmul.mubr.bf16.gmra.mrb[40].mxu0 %v357_v21  ;;  %v333_v31 = vmax.f32 %v273_v24, 0.0 }
 0x16f   :  { %v279_v30 = vadd.f32 %v278_v29, %v1558_v43  ;;  %v334_v33 = vmax.f32 %v275_v26, 0.0 }
 0x170   :  { %v335_v32 = vmax.f32 %v277_v28, 0.0 }
 0x171   :  { %v336_v34 = vmax.f32 %v279_v30, 0.0 }
 0x172   :  { %v359_v35 = vpack.c.bf16 %v335_v32, %v333_v31 }
 0x173   :  { %v282_v10 = vpop.f32.mrb[16].mxu0  ;;  %v360_v36 = vpack.c.bf16 %v336_v34, %v334_v33 }
 0x174   :  { %v283_v40 = vadd.f32 %v282_v10, %v1555_v42  ;;  %v284_v44 = vpop.f32.mrb[17].mxu0 }
 0x175   :  { %v285_v45 = vadd.f32 %v284_v44, %v1558_v43  ;;  %v286_v46 = vpop.f32.mrb[18].mxu0  ;;  %635 = vmatprep.mubr.bf16.mxu1 %v360_v36 }
 0x176   :  { %v287_v47 = vadd.f32 %v286_v46, %v1555_v42  ;;  %v288_v48 = vpop.f32.mrb[19].mxu0  ;;  %636 = vmatmul.mubr.bf16.vlgmr.msra.gmra.mrb[0].mxu1 %v359_v35  ;;  %v337_v50 = vmax.f32 %v283_v40, 0.0  ;;  %v401_v35 = vld [vmem:[%s1750_s5] sm:$0x3] }
 0x177   :  { %v289_v49 = vadd.f32 %v288_v48, %v1558_v43  ;;  %v338_v52 = vmax.f32 %v285_v45, 0.0  ;;  %v1596_v10 = vrot.slane %v401_v35, %v1546_v39 }
 0x178   :  { %v339_v51 = vmax.f32 %v287_v47, 0.0 }
 0x179   :  { %v340_v53 = vmax.f32 %v289_v49, 0.0 }
 0x17a   :  { %v361_v54 = vpack.c.bf16 %v339_v51, %v337_v50 }
 0x17b   :  { %v362_v55 = vpack.c.bf16 %v340_v53, %v338_v52  ;;  %v292_v56 = vpop.f32.mrb[20].mxu0 }
 0x17c   :  { %v293_v57 = vadd.f32 %v292_v56, %v1555_v42  ;;  %v294_v58 = vpop.f32.mrb[21].mxu0 }
 0x17d   :  { %v295_v59 = vadd.f32 %v294_v58, %v1558_v43  ;;  %v296_v60 = vpop.f32.mrb[22].mxu0  ;;  %645 = vmatprep.mubr.bf16.mxu1 %v362_v55 }
 0x17e   :  { %v297_v61 = vadd.f32 %v296_v60, %v1555_v42  ;;  %v298_v62 = vpop.f32.mrb[23].mxu0  ;;  %646 = vmatmul.mubr.bf16.gmra.mrb[4].mxu1 %v361_v54  ;;  %v341_v0 = vmax.f32 %v293_v57, 0.0 }
 0x17f   :  { %v299_v63 = vadd.f32 %v298_v62, %v1558_v43  ;;  %v342_v2 = vmax.f32 %v295_v59, 0.0 }
 0x180   :  { %v343_v1 = vmax.f32 %v297_v61, 0.0 }
 0x181   :  { %v344_v3 = vmax.f32 %v299_v63, 0.0 }
 0x182   :  { %v363_v4 = vpack.c.bf16 %v343_v1, %v341_v0 }
 0x183   :  { %v364_v5 = vpack.c.bf16 %v344_v3, %v342_v2  ;;  %v302_v6 = vpop.f32.mrb[24].mxu0 }
 0x184   :  { %v303_v7 = vadd.f32 %v302_v6, %v1555_v42  ;;  %v304_v8 = vpop.f32.mrb[25].mxu0 }
 0x185   :  { %v305_v9 = vadd.f32 %v304_v8, %v1558_v43  ;;  %v306_v11 = vpop.f32.mrb[26].mxu0  ;;  %655 = vmatprep.mubr.bf16.mxu1 %v364_v5 }
 0x186   :  { %v307_v12 = vadd.f32 %v306_v11, %v1555_v42  ;;  %v308_v13 = vpop.f32.mrb[27].mxu0  ;;  %656 = vmatmul.mubr.bf16.gmra.mrb[8].mxu1 %v363_v4  ;;  %v345_v15 = vmax.f32 %v303_v7, 0.0 }
 0x187   :  { %v309_v14 = vadd.f32 %v308_v13, %v1558_v43  ;;  %v346_v17 = vmax.f32 %v305_v9, 0.0 }
 0x188   :  { %v347_v16 = vmax.f32 %v307_v12, 0.0 }
 0x189   :  { %v348_v18 = vmax.f32 %v309_v14, 0.0 }
 0x18a   :  { %v365_v19 = vpack.c.bf16 %v347_v16, %v345_v15 }
 0x18b   :  { %v366_v20 = vpack.c.bf16 %v348_v18, %v346_v17  ;;  %v312_v21 = vpop.f32.mrb[28].mxu0 }
 0x18c   :  { %v313_v22 = vadd.f32 %v312_v21, %v1555_v42  ;;  %v314_v23 = vpop.f32.mrb[29].mxu0 }
 0x18d   :  { %v315_v24 = vadd.f32 %v314_v23, %v1558_v43  ;;  %v316_v25 = vpop.f32.mrb[30].mxu0  ;;  %665 = vmatprep.mubr.bf16.mxu1 %v366_v20 }
 0x18e   :  { %v317_v26 = vadd.f32 %v316_v25, %v1555_v42  ;;  %v318_v27 = vpop.f32.mrb[31].mxu0  ;;  %666 = vmatmul.mubr.bf16.gmra.mrb[12].mxu1 %v365_v19  ;;  %v349_v29 = vmax.f32 %v313_v22, 0.0  ;;  %v718_v42 = vld [vmem:[%s1751_s6] sm:$0x3] }
 0x18f   :  { %v319_v28 = vadd.f32 %v318_v27, %v1558_v43  ;;  %v350_v31 = vmax.f32 %v315_v24, 0.0  ;;  %v1602_v43 = vrot.slane %v401_v35, %v1552_v41  ;;  %v1606_v44 = vrot.slane %v718_v42, %v1546_v39 }
 0x190   :  { %v351_v30 = vmax.f32 %v317_v26, 0.0  ;;  %v1610_v47 = vrot.slane %v718_v42, %v1552_v41 }
 0x191   :  { %v352_v32 = vmax.f32 %v319_v28, 0.0 }
 0x192   :  { %v367_v33 = vpack.c.bf16 %v351_v30, %v349_v29 }
 0x193   :  { %v368_v34 = vpack.c.bf16 %v352_v32, %v350_v31 }
 0x195   :  { %675 = vmatprep.mubr.bf16.mxu1 %v368_v34 }
 0x196   :  { %676 = vmatmul.mubr.bf16.gmra.mrb[16].mxu1 %v367_v33 }
 0x231   :  { %v607_v36 = vpop.f32.mrb[32].mxu0 }
 0x232   :  { %v608_v40 = vadd.f32 %v607_v36, %v1596_v10  ;;  %v609_v45 = vpop.f32.mrb[33].mxu0 }
 0x233   :  { %v610_v46 = vadd.f32 %v609_v45, %v1602_v43  ;;  %v611_v48 = vpop.f32.mrb[34].mxu0 }
 0x234   :  { %v686_v49 = vmax.f32 %v608_v40, 0.0  ;;  %v612_v50 = vadd.f32 %v611_v48, %v1596_v10  ;;  %v613_v51 = vpop.f32.mrb[35].mxu0 }
 0x235   :  { %v687_v52 = vmax.f32 %v610_v46, 0.0  ;;  %v614_v53 = vadd.f32 %v613_v51, %v1602_v43 }
 0x236   :  { %v730_v54 = vmul.f32 %v1606_v44, %v686_v49  ;;  %v688_v55 = vmax.f32 %v612_v50, 0.0 }
 0x237   :  { %v731_v39 = vmul.f32 %v1610_v47, %v687_v52  ;;  %v689_v56 = vmax.f32 %v614_v53, 0.0 }
 0x238   :  { %v732_v57 = vmul.f32 %v1606_v44, %v688_v55 }
 0x239   :  { %v733_v58 = vmul.f32 %v1610_v47, %v689_v56  ;;  %v617_v41 = vpop.f32.mrb[36].mxu0  ;;  %v762_v59 = vadd.f32 %v731_v39, %v730_v54 }
 0x23a   :  { %v618_v60 = vadd.f32 %v617_v41, %v1596_v10  ;;  %v619_v61 = vpop.f32.mrb[37].mxu0 }
 0x23b   :  { %v620_v62 = vadd.f32 %v619_v61, %v1602_v43  ;;  %v621_v63 = vpop.f32.mrb[38].mxu0  ;;  %763 = vadd.xlane.f32.xlu0 %v762_v59  ;;  %v765_v0 = vadd.f32 %v733_v58, %v732_v57 }
 0x23c   :  { %v690_v1 = vmax.f32 %v618_v60, 0.0  ;;  %v622_v2 = vadd.f32 %v621_v63, %v1596_v10  ;;  %v623_v3 = vpop.f32.mrb[39].mxu0 }
 0x23d   :  { %v691_v4 = vmax.f32 %v620_v62, 0.0  ;;  %v624_v5 = vadd.f32 %v623_v3, %v1602_v43  ;;  %766 = vadd.xlane.f32.xlu1 %v765_v0 }
 0x23e   :  { %v734_v6 = vmul.f32 %v1606_v44, %v690_v1  ;;  %v692_v7 = vmax.f32 %v622_v2, 0.0 }
 0x23f   :  { %v735_v8 = vmul.f32 %v1610_v47, %v691_v4  ;;  %v693_v9 = vmax.f32 %v624_v5, 0.0 }
 0x240   :  { %v736_v11 = vmul.f32 %v1606_v44, %v692_v7 }
 0x241   :  { %v737_v12 = vmul.f32 %v1610_v47, %v693_v9  ;;  %v627_v13 = vpop.f32.mrb[40].mxu0  ;;  %v768_v14 = vadd.f32 %v735_v8, %v734_v6 }
 0x242   :  { %v628_v15 = vadd.f32 %v627_v13, %v1596_v10  ;;  %v629_v16 = vpop.f32.mrb[41].mxu0 }
 0x243   :  { %v630_v17 = vadd.f32 %v629_v16, %v1602_v43  ;;  %v631_v18 = vpop.f32.mrb[42].mxu0  ;;  %769 = vadd.xlane.f32.xlu0 %v768_v14  ;;  %v771_v19 = vadd.f32 %v737_v12, %v736_v11 }
 0x244   :  { %v694_v20 = vmax.f32 %v628_v15, 0.0  ;;  %v632_v21 = vadd.f32 %v631_v18, %v1596_v10  ;;  %v633_v22 = vpop.f32.mrb[43].mxu0 }
 0x245   :  { %v695_v23 = vmax.f32 %v630_v17, 0.0  ;;  %v634_v24 = vadd.f32 %v633_v22, %v1602_v43 }
 0x246   :  { %v738_v25 = vmul.f32 %v1606_v44, %v694_v20  ;;  %v696_v26 = vmax.f32 %v632_v21, 0.0 }
 0x247   :  { %v739_v27 = vmul.f32 %v1610_v47, %v695_v23  ;;  %v697_v28 = vmax.f32 %v634_v24, 0.0  ;;  %772 = vadd.xlane.f32.xlu0 %v771_v19 }
 0x248   :  { %v740_v29 = vmul.f32 %v1606_v44, %v696_v26 }
 0x249   :  { %v741_v30 = vmul.f32 %v1610_v47, %v697_v28  ;;  %v637_v31 = vpop.f32.mrb[0].mxu1  ;;  %v774_v32 = vadd.f32 %v739_v27, %v738_v25 }
 0x24a   :  { %v638_v33 = vadd.f32 %v637_v31, %v1596_v10  ;;  %v639_v34 = vpop.f32.mrb[1].mxu1 }
 0x24b   :  { %v640_v35 = vadd.f32 %v639_v34, %v1602_v43  ;;  %v641_v42 = vpop.f32.mrb[2].mxu1  ;;  %775 = vadd.xlane.f32.xlu1 %v774_v32  ;;  %v777_v36 = vadd.f32 %v741_v30, %v740_v29 }
 0x24c   :  { %v698_v40 = vmax.f32 %v638_v33, 0.0  ;;  %v642_v45 = vadd.f32 %v641_v42, %v1596_v10  ;;  %v643_v46 = vpop.f32.mrb[3].mxu1 }
 0x24d   :  { %v699_v48 = vmax.f32 %v640_v35, 0.0  ;;  %v644_v49 = vadd.f32 %v643_v46, %v1602_v43  ;;  %778 = vadd.xlane.f32.xlu0 %v777_v36 }
 0x24e   :  { %v742_v50 = vmul.f32 %v1606_v44, %v698_v40  ;;  %v700_v51 = vmax.f32 %v642_v45, 0.0 }
 0x24f   :  { %v743_v52 = vmul.f32 %v1610_v47, %v699_v48  ;;  %v701_v53 = vmax.f32 %v644_v49, 0.0 }
 0x250   :  { %v744_v54 = vmul.f32 %v1606_v44, %v700_v51 }
 0x251   :  { %v745_v55 = vmul.f32 %v1610_v47, %v701_v53  ;;  %v647_v39 = vpop.f32.mrb[4].mxu1  ;;  %v780_v56 = vadd.f32 %v743_v52, %v742_v50 }
 0x252   :  { %v648_v57 = vadd.f32 %v647_v39, %v1596_v10  ;;  %v649_v58 = vpop.f32.mrb[5].mxu1 }
 0x253   :  { %v650_v41 = vadd.f32 %v649_v58, %v1602_v43  ;;  %v651_v59 = vpop.f32.mrb[6].mxu1  ;;  %781 = vadd.xlane.f32.xlu1 %v780_v56  ;;  %v783_v60 = vadd.f32 %v745_v55, %v744_v54 }
 0x254   :  { %v702_v61 = vmax.f32 %v648_v57, 0.0  ;;  %v652_v62 = vadd.f32 %v651_v59, %v1596_v10  ;;  %v653_v63 = vpop.f32.mrb[7].mxu1 }
 0x255   :  { %v703_v0 = vmax.f32 %v650_v41, 0.0  ;;  %v654_v1 = vadd.f32 %v653_v63, %v1602_v43  ;;  %784 = vadd.xlane.f32.xlu0 %v783_v60 }
 0x256   :  { %v746_v2 = vmul.f32 %v1606_v44, %v702_v61  ;;  %v704_v3 = vmax.f32 %v652_v62, 0.0 }
 0x257   :  { %v747_v4 = vmul.f32 %v1610_v47, %v703_v0  ;;  %v705_v5 = vmax.f32 %v654_v1, 0.0 }
 0x258   :  { %v748_v6 = vmul.f32 %v1606_v44, %v704_v3 }
 0x259   :  { %v749_v7 = vmul.f32 %v1610_v47, %v705_v5  ;;  %v657_v8 = vpop.f32.mrb[8].mxu1  ;;  %v786_v9 = vadd.f32 %v747_v4, %v746_v2 }
 0x25a   :  { %v658_v11 = vadd.f32 %v657_v8, %v1596_v10  ;;  %v659_v12 = vpop.f32.mrb[9].mxu1 }
 0x25b   :  { %v660_v13 = vadd.f32 %v659_v12, %v1602_v43  ;;  %v661_v14 = vpop.f32.mrb[10].mxu1  ;;  %787 = vadd.xlane.f32.xlu1 %v786_v9  ;;  %v789_v15 = vadd.f32 %v749_v7, %v748_v6  ;;  %v1675_v6 = vand.u32 127, %v153_v37 }
 0x25c   :  { %v706_v16 = vmax.f32 %v658_v11, 0.0  ;;  %v662_v17 = vadd.f32 %v661_v14, %v1596_v10  ;;  %v663_v18 = vpop.f32.mrb[11].mxu1 }
 0x25d   :  { %v707_v19 = vmax.f32 %v660_v13, 0.0  ;;  %v664_v20 = vadd.f32 %v663_v18, %v1602_v43  ;;  %790 = vadd.xlane.f32.xlu0 %v789_v15  ;;  %v850_v7 = vadd.s32 4294967288, %v1675_v6  ;;  %v857_v9 = vadd.s32 4294967280, %v1675_v6 }
 0x25e   :  { %v750_v21 = vmul.f32 %v1606_v44, %v706_v16  ;;  %v708_v22 = vmax.f32 %v662_v17, 0.0  ;;  %v863_v11 = vadd.s32 4294967272, %v1675_v6  ;;  %v869_v12 = vadd.s32 4294967264, %v1675_v6 }
 0x25f   :  { %v751_v23 = vmul.f32 %v1610_v47, %v707_v19  ;;  %v709_v24 = vmax.f32 %v664_v20, 0.0  ;;  %v853_v13 = vsub.s32 %v850_v7, %v1543_v38  ;;  %v848_v15 = vsub.s32 %v1675_v6, %v1543_v38 }
 0x260   :  { %v752_v25 = vmul.f32 %v1606_v44, %v708_v22  ;;  %v860_v16 = vsub.s32 %v857_v9, %v1543_v38  ;;  %v866_v19 = vsub.s32 %v863_v11, %v1543_v38  ;;  %v872_v22 = vsub.s32 %v869_v12, %v1543_v38 }
 0x261   :  { %v753_v26 = vmul.f32 %v1610_v47, %v709_v24  ;;  %v667_v27 = vpop.f32.mrb[12].mxu1  ;;  %v792_v28 = vadd.f32 %v751_v23, %v750_v21  ;;  %v876_v21 = vadd.s32 4294967256, %v1675_v6  ;;  %v932_v11 = vadd.s32 4294967192, %v1675_v6 }
 0x262   :  { %v668_v29 = vadd.f32 %v667_v27, %v1596_v10  ;;  %v669_v30 = vpop.f32.mrb[13].mxu1 }
 0x263   :  { %v670_v31 = vadd.f32 %v669_v30, %v1602_v43  ;;  %v671_v32 = vpop.f32.mrb[14].mxu1  ;;  %793 = vadd.xlane.f32.xlu1 %v792_v28  ;;  %v795_v33 = vadd.f32 %v753_v26, %v752_v25  ;;  %v883_v25 = vadd.s32 4294967248, %v1675_v6 }
 0x264   :  { %v710_v34 = vmax.f32 %v668_v29, 0.0  ;;  %v672_v35 = vadd.f32 %v671_v32, %v1596_v10  ;;  %v673_v42 = vpop.f32.mrb[15].mxu1  ;;  %v890_v29 = vadd.s32 4294967240, %v1675_v6  ;;  %v879_v32 = vsub.s32 %v876_v21, %v1543_v38 }
 0x265   :  { %v711_v36 = vmax.f32 %v670_v31, 0.0  ;;  %v674_v40 = vadd.f32 %v673_v42, %v1602_v43  ;;  %796 = vadd.xlane.f32.xlu0 %v795_v33 }
 0x266   :  { %v754_v45 = vmul.f32 %v1606_v44, %v710_v34  ;;  %v712_v46 = vmax.f32 %v672_v35, 0.0  ;;  %v886_v35 = vsub.s32 %v883_v25, %v1543_v38 }
 0x267   :  { %v755_v48 = vmul.f32 %v1610_v47, %v711_v36  ;;  %v713_v49 = vmax.f32 %v674_v40, 0.0  ;;  %v897_v40 = vadd.s32 4294967232, %v1675_v6 }
 0x268   :  { %v756_v50 = vmul.f32 %v1606_v44, %v712_v46 }
 0x269   :  { %v757_v51 = vmul.f32 %v1610_v47, %v713_v49  ;;  %v677_v52 = vpop.f32.mrb[16].mxu1  ;;  %v798_v53 = vadd.f32 %v755_v48, %v754_v45  ;;  %v893_v49 = vsub.s32 %v890_v29, %v1543_v38 }
 0x26a   :  { %v678_v54 = vadd.f32 %v677_v52, %v1596_v10  ;;  %v679_v55 = vpop.f32.mrb[17].mxu1 }
 0x26b   :  { %v680_v39 = vadd.f32 %v679_v55, %v1602_v43  ;;  %v681_v56 = vpop.f32.mrb[18].mxu1  ;;  %799 = vadd.xlane.f32.xlu1 %v798_v53  ;;  %v801_v57 = vadd.f32 %v757_v51, %v756_v50  ;;  %v904_v50 = vadd.s32 4294967224, %v1675_v6 }
 0x26c   :  { %v714_v58 = vmax.f32 %v678_v54, 0.0  ;;  %v682_v41 = vadd.f32 %v681_v56, %v1596_v10  ;;  %v683_v59 = vpop.f32.mrb[19].mxu1  ;;  %v911_v54 = vadd.s32 4294967216, %v1675_v6  ;;  %v900_v56 = vsub.s32 %v897_v40, %v1543_v38 }
 0x26d   :  { %v715_v60 = vmax.f32 %v680_v39, 0.0  ;;  %v684_v61 = vadd.f32 %v683_v59, %v1602_v43  ;;  %802 = vadd.xlane.f32.xlu0 %v801_v57  ;;  %v907_v59 = vsub.s32 %v904_v50, %v1543_v38 }
 0x26e   :  { %v758_v62 = vmul.f32 %v1606_v44, %v714_v58  ;;  %v716_v63 = vmax.f32 %v682_v41, 0.0 }
 0x26f   :  { %v759_v0 = vmul.f32 %v1610_v47, %v715_v60  ;;  %v717_v1 = vmax.f32 %v684_v61, 0.0  ;;  %v918_v60 = vadd.s32 4294967208, %v1675_v6 }
 0x270   :  { %v760_v2 = vmul.f32 %v1606_v44, %v716_v63  ;;  %v1683_v44 = vstv %s1752_s7  ;;  %s1128_s7 = smov [#allocation4]  }
 0x271   :  { %v761_v3 = vmul.f32 %v1610_v47, %v717_v1  ;;  %v804_v4 = vadd.f32 %v759_v0, %v758_v62  ;;  %v914_v0 = vsub.s32 %v911_v54, %v1543_v38  ;;  %s961_s27 = sshll.u32 %s1128_s7, 4  ;;  %s962_s27 = int_to_ptr.vmem [resolvable:$true] %s961_s27 }
 0x272   :  { %s1102_s21 = scalar_lea.vmem %s962_s27, 16  ;;  %s1106_s28 = scalar_lea.vmem %s962_s27, 32 }
 0x273   :  { %805 = vadd.xlane.f32.xlu1 %v804_v4  ;;  %v807_v5 = vadd.f32 %v761_v3, %v760_v2  ;;  %p1103_p0 = scmp.ne.s32.totalorder %s962_s27, %s1102_s21  ;;  %p1107_p1 = scmp.lt.s32.totalorder %s962_s27, %s962_s27 }
 0x274   :  { %p1108_p2 = scmp.lt.s32.totalorder %s1106_s28, %s1102_s21 }
 0x275   :  { %808 = vadd.xlane.f32.xlu0 %v807_v5  ;;  %v925_v5 = vadd.s32 4294967200, %v1675_v6 }
 0x276   :  { %p1109_p3 = por %p1108_p2, %p1107_p1 }
 0x278   :  { %p1110_p4 = pnand %p1109_p3, %p1103_p0 }
 0x2c8   :  { %v764_v10 = vpop.xlane.xlu0 %763 }
 0x2c9   :  { %v812_v18 = vadd.f32 %v1683_v44, %v764_v10  ;;  %v921_v10 = vsub.s32 %v918_v60, %v1543_v38 }
 0x2ca   :  { %v767_v8 = vpop.xlane.xlu1 %766 }
 0x2cb   :  { %v813_v37 = vadd.f32 %v1683_v44, %v767_v8  ;;  %v849_v30 = vrot.slane %v812_v18, %v848_v15  ;;  %v939_v15 = vadd.s32 4294967184, %v1675_v6  ;;  %v935_v18 = vsub.s32 %v932_v11, %v1543_v38 }
 0x2cd   :  { %v854_v26 = vrot.slane %v813_v37, %v853_v13  ;;  %v928_v13 = vsub.s32 %v925_v5, %v1543_v38 }
 0x2cf   :  { %v856_v45 = vsel %vm855_vm4, %v854_v26, %v849_v30 }
 0x2d0   :  { %v770_v43 = vpop.xlane.xlu0 %769 }
 0x2d1   :  { %v814_v17 = vadd.f32 %v1683_v44, %v770_v43 }
 0x2d3   :  { %v861_v28 = vrot.slane %v814_v17, %v860_v16 }
 0x2d4   :  { %v773_v47 = vpop.xlane.xlu0 %772 }
 0x2d5   :  { %v815_v20 = vadd.f32 %v1683_v44, %v773_v47  ;;  %v862_v48 = vsel %vm121_vm1, %v861_v28, %v856_v45 }
 0x2d7   :  { %v867_v31 = vrot.slane %v815_v20, %v866_v19 }
 0x2d8   :  { %v776_v14 = vpop.xlane.xlu1 %775 }
 0x2d9   :  { %v816_v23 = vadd.f32 %v1683_v44, %v776_v14  ;;  %v868_v51 = vsel %vm130_vm2, %v867_v31, %v862_v48 }
 0x2da   :  { %v779_v24 = vpop.xlane.xlu0 %778 }
 0x2db   :  { %v817_v33 = vadd.f32 %v1683_v44, %v779_v24  ;;  %v873_v34 = vrot.slane %v816_v23, %v872_v22  ;;  %v946_v22 = vadd.s32 4294967176, %v1675_v6  ;;  %v942_v23 = vsub.s32 %v939_v15, %v1543_v38 }
 0x2dd   :  { %v880_v52 = vrot.slane %v817_v33, %v879_v32  ;;  %v875_v55 = vsel %vm874_vm5, %v873_v34, %v868_v51  ;;  %v949_v29 = vsub.s32 %v946_v22, %v1543_v38 }
 0x2df   :  { %v882_v61 = vsel %vm881_vm6, %v880_v52, %v875_v55 }
 0x2e0   :  { %v782_v27 = vpop.xlane.xlu1 %781 }
 0x2e1   :  { %v818_v42 = vadd.f32 %v1683_v44, %v782_v27 }
 0x2e2   :  { %v785_v36 = vpop.xlane.xlu0 %784 }
 0x2e3   :  { %v819_v53 = vadd.f32 %v1683_v44, %v785_v36  ;;  %v887_v39 = vrot.slane %v818_v42, %v886_v35 }
 0x2e5   :  { %v894_v62 = vrot.slane %v819_v53, %v893_v49  ;;  %v889_v1 = vsel %vm888_vm7, %v887_v39, %v882_v61 }
 0x2e7   :  { %v896_v43 = vsel %vm895_vm8, %v894_v62, %v889_v1 }
 0x2e8   :  { %v788_v46 = vpop.xlane.xlu1 %787 }
 0x2e9   :  { %v820_v57 = vadd.f32 %v1683_v44, %v788_v46 }
 0x2ea   :  { %v791_v58 = vpop.xlane.xlu0 %790 }
 0x2eb   :  { %v821_v63 = vadd.f32 %v1683_v44, %v791_v58  ;;  %v901_v2 = vrot.slane %v820_v57, %v900_v56 }
 0x2ed   :  { %v908_v7 = vrot.slane %v821_v63, %v907_v59  ;;  %v903_v47 = vsel %vm902_vm9, %v901_v2, %v896_v43 }
 0x2ef   :  { %v910_v16 = vsel %vm909_vm10, %v908_v7, %v903_v47 }
 0x2f0   :  { %v794_v41 = vpop.xlane.xlu1 %793 }
 0x2f1   :  { %v822_v3 = vadd.f32 %v1683_v44, %v794_v41 }
 0x2f2   :  { %v797_v4 = vpop.xlane.xlu0 %796 }
 0x2f3   :  { %v823_v8 = vadd.f32 %v1683_v44, %v797_v4  ;;  %v915_v12 = vrot.slane %v822_v3, %v914_v0 }
 0x2f5   :  { %v922_v17 = vrot.slane %v823_v8, %v921_v10  ;;  %v917_v20 = vsel %vm916_vm11, %v915_v12, %v910_v16 }
 0x2f7   :  { %v924_v24 = vsel %vm923_vm12, %v922_v17, %v917_v20 }
 0x2f8   :  { %v800_v9 = vpop.xlane.xlu1 %799 }
 0x2f9   :  { %v824_v37 = vadd.f32 %v1683_v44, %v800_v9 }
 0x2fa   :  { %v803_v14 = vpop.xlane.xlu0 %802 }
 0x2fb   :  { %v825_v19 = vadd.f32 %v1683_v44, %v803_v14  ;;  %v929_v21 = vrot.slane %v824_v37, %v928_v13 }
 0x2fd   :  { %v936_v25 = vrot.slane %v825_v19, %v935_v18  ;;  %v931_v27 = vsel %vm930_vm13, %v929_v21, %v924_v24 }
 0x2ff   :  { %v938_v6 = vsel %vm937_vm14, %v936_v25, %v931_v27 }
 0x300   :  { %v806_v26 = vpop.xlane.xlu1 %805 }
 0x301   :  { %v826_v28 = vadd.f32 %v1683_v44, %v806_v26 }
 0x302   :  { %v809_v30 = vpop.xlane.xlu0 %808 }
 0x303   :  { %v943_v31 = vrot.slane %v826_v28, %v942_v23  ;;  %v827_v32 = vadd.f32 %v1683_v44, %v809_v30 }
 0x305   :  { %v950_v33 = vrot.slane %v827_v32, %v949_v29  ;;  %v945_v34 = vsel %vm944_vm15, %v943_v31, %v938_v6 }
 0x307   :  { %v952_v35 = vsel %vm951_vm0, %v950_v33, %v945_v34 }
 0x308   :  { %954 = vst [vmem:[#allocation4] sm:$0x1] %v952_v35 }
 0x309   :  { %1113 = shalt.err (!%p1110_p4)
}
 0x30a   :  { %s1114_s30 = scalar_lea.hbm %s1753_s8, 16 }
 0x30b   :  { %p1115_p5 = scmp.ne.s32.totalorder %s1753_s8, %s1114_s30  ;;  %p1118_p6 = scmp.lt.u32.totalorder %s1114_s30, %s1753_s8 }
 0x30d   :  { %p1120_p7 = pnand %p1118_p6, %p1115_p5 }
 0x30f   :  { %1123 = shalt.err (!%p1120_p7)
}
 0x310   :  { %964 = dma.vmem_to_hbm [thread:$0]  %s962_s27, 16, %s1753_s8, [#allocation5]  }
 0x311   :  { %1124 = dma.done.wait [#allocation5], 16  }
 0x312   :  { %1125 = vsyncadd [#allocation5], 4294967280 }
 0x313   :  { %968 = vsyncpa [#allocation5], 1 }

</bundles_post_ra>
